<compile_context>
chip_gen: v7x
topology: tpu7x:2x2x1
jax: 0.10.0
libtpu: 0.0.40
codegen_flags: <defaults>
</compile_context>

<pallas_src>
import functools

import jax
import jax.numpy as jnp
from jax import lax
from jax.experimental import pallas as pl
from jax.experimental.pallas import tpu as pltpu


def _round_up(x, m):
    return ((x + m - 1) // m) * m


def _softplus(x):
    # Matches torch.nn.Softplus(beta=1, threshold=20):
    #   x             if x > 20
    #   log1p(exp(x)) otherwise
    return jnp.where(x > 20.0, x, jnp.log1p(jnp.exp(jnp.minimum(x, 20.0))))


def _zparams_kernel(z_dim, x_ref, w_ref, b_ref, out_ref):
    """Fused Zparams forward for one M-tile.

    out[:, :z_dim]        = x @ W_mean   + b_mean
    out[:, z_dim:2*z_dim] = softplus(x @ W_logvar + b_logvar)
    out[:, 2*z_dim:]      = padding lanes (discarded by the wrapper)
    """
    x = x_ref[...].astype(jnp.float32)
    h = jnp.dot(x, w_ref[...], preferred_element_type=jnp.float32) + b_ref[...]
    # Lane-index mask: columns >= z_dim are the logvar head (or discarded
    # padding), so softplus them; columns < z_dim are the mean head.
    col = lax.broadcasted_iota(jnp.int32, h.shape, 1)
    out = jnp.where(col >= z_dim, _softplus(h), h)
    out_ref[...] = out.astype(out_ref.dtype)


def pack_zparams_params(w_mean, b_mean, w_logvar, b_logvar):
    """Fuse the two heads; pad ONLY the output (N) dim to a lane multiple.

    w_* are torch-layout [z_dim, s_dim]; b_* are [z_dim].
    Returns (w_pad [s_dim, N_pad], b_pad [1, N_pad]) with N_pad a multiple of 128.
    """
    z_dim, s_dim = w_mean.shape
    n_pad = _round_up(2 * z_dim, 128)
    w_cat = jnp.concatenate([w_mean.T, w_logvar.T], axis=1)        # [s_dim, 2*z_dim]
    b_cat = jnp.concatenate([b_mean, b_logvar], axis=0)[None, :]   # [1, 2*z_dim]
    w_pad = jnp.zeros((s_dim, n_pad), jnp.float32).at[:, :2 * z_dim].set(
        w_cat.astype(jnp.float32))
    b_pad = jnp.zeros((1, n_pad), jnp.float32).at[:, :2 * z_dim].set(
        b_cat.astype(jnp.float32))
    return w_pad, b_pad


def zparams_forward(s, w_pad, b_pad, z_dim, *, tile_m=1024):
    """s: [..., s_dim]  ->  (z_mean [..., z_dim, 1], z_logvar [..., z_dim, 1])."""
    *lead, s_dim = s.shape
    x2d = s.reshape(-1, s_dim)                  # keep caller dtype (no cast pass)
    m = x2d.shape[0]
    k_dim, n_pad = w_pad.shape
    assert k_dim == s_dim, "packed weights do not match s_dim"

    # Sublane packing multiple for the I/O dtype: 8 (f32), 16 (bf16), 32 (int8).
    itemsize = jnp.dtype(s.dtype).itemsize
    sub = max(8, 32 // max(itemsize, 1))

    # Big M tile to amortize per-grid-step overhead, but cap at ~ceil(M/2) so
    # large M always gives >= 2 grid steps (both v7x TensorCores busy).
    tm = min(tile_m, max(sub, _round_up(pl.cdiv(m, 2), sub)))
    grid_m = pl.cdiv(m, tm)                     # ragged last block is fine

    out = pl.pallas_call(
        functools.partial(_zparams_kernel, z_dim),
        grid=(grid_m,),
        in_specs=[
            pl.BlockSpec((tm, s_dim), lambda i: (i, 0)),     # activations: M-tiled, K unpadded
            pl.BlockSpec((s_dim, n_pad), lambda i: (0, 0)),  # fused weights: resident
            pl.BlockSpec((1, n_pad), lambda i: (0, 0)),      # fused bias: resident
        ],
        out_specs=pl.BlockSpec((tm, n_pad), lambda i: (i, 0)),  # lane-dense output
        out_shape=jax.ShapeDtypeStruct((m, n_pad), s.dtype),    # caller dtype I/O
        compiler_params=pltpu.CompilerParams(
            dimension_semantics=("parallel",),
        ),
    )(x2d, w_pad, b_pad)

    # Single slice of the padded result; the remaining splits / the trailing
    # unsqueeze(-1) are cheap static ops on the small fused block.
    fused = out[:, :2 * z_dim].reshape(*lead, 2 * z_dim)
    z_mean = fused[..., :z_dim][..., None]
    z_logvar = fused[..., z_dim:][..., None]
    return z_mean, z_logvar


def init_zparams_params(key, s_dim, z_dim):
    """torch.nn.Linear default init: W, b ~ U(-1/sqrt(in), 1/sqrt(in))."""
    k1, k2, k3, k4 = jax.random.split(key, 4)
    bound = 1.0 / (s_dim ** 0.5)
    w_mean = jax.random.uniform(k1, (z_dim, s_dim), minval=-bound, maxval=bound,
                                dtype=jnp.float32)
    b_mean = jax.random.uniform(k2, (z_dim,), minval=-bound, maxval=bound,
                                dtype=jnp.float32)
    w_logvar = jax.random.uniform(k3, (z_dim, s_dim), minval=-bound, maxval=bound,
                                  dtype=jnp.float32)
    b_logvar = jax.random.uniform(k4, (z_dim,), minval=-bound, maxval=bound,
                                  dtype=jnp.float32)
    return w_mean, b_mean, w_logvar, b_logvar


def _reference(s, w_mean, b_mean, w_logvar, b_logvar):
    ref_mean = (jnp.dot(s, w_mean.T) + b_mean)[..., None]
    h_lv = jnp.dot(s, w_logvar.T) + b_logvar
    ref_logvar = jnp.where(h_lv > 20.0, h_lv,
                           jnp.log1p(jnp.exp(jnp.minimum(h_lv, 20.0))))[..., None]
    return ref_mean, ref_logvar


if __name__ == "__main__":
    key = jax.random.PRNGKey(0)

    # Small shapes consistent with the module: s is the aggregated
    # representation [batch, s_dim]; z_dim is the latent size.
    batch, s_dim, z_dim = 8, 32, 4

    key, ks, ks3, kp = jax.random.split(key, 4)
    s = jax.random.normal(ks, (batch, s_dim), dtype=jnp.float32)
    w_mean, b_mean, w_logvar, b_logvar = init_zparams_params(kp, s_dim, z_dim)

    # Pack (fuse + N-pad) once, outside the per-call path.
    w_pad, b_pad = pack_zparams_params(w_mean, b_mean, w_logvar, b_logvar)

    # --- 2-D input ---
    z_mean, z_logvar = zparams_forward(s, w_pad, b_pad, z_dim)
    jax.block_until_ready((z_mean, z_logvar))

    ref_mean, ref_logvar = _reference(s, w_mean, b_mean, w_logvar, b_logvar)
    assert z_mean.shape == (batch, z_dim, 1)
    assert z_logvar.shape == (batch, z_dim, 1)
    assert jnp.allclose(z_mean, ref_mean, atol=1e-4, rtol=1e-4)
    assert jnp.allclose(z_logvar, ref_logvar, atol=1e-4, rtol=1e-4)
    assert bool(jnp.all(jnp.isfinite(z_mean))) and bool(jnp.all(jnp.isfinite(z_logvar)))

    # --- 3-D input exercising leading-dim flatten, multi-step grid and a
    #     ragged (partial) last M block ---
    s3 = jax.random.normal(ks3, (2, 50, s_dim), dtype=jnp.float32)
    z_mean3, z_logvar3 = zparams_forward(s3, w_pad, b_pad, z_dim)
    jax.block_until_ready((z_mean3, z_logvar3))

    ref_mean3, ref_logvar3 = _reference(s3, w_mean, b_mean, w_logvar, b_logvar)
    assert z_mean3.shape == (2, 50, z_dim, 1)
    assert z_logvar3.shape == (2, 50, z_dim, 1)
    assert jnp.allclose(z_mean3, ref_mean3, atol=1e-4, rtol=1e-4)
    assert jnp.allclose(z_logvar3, ref_logvar3, atol=1e-4, rtol=1e-4)
    assert bool(jnp.all(jnp.isfinite(z_mean3))) and bool(jnp.all(jnp.isfinite(z_logvar3)))

    print("KERNEL_OK")
</pallas_src>

<mosaic_0001>
module attributes {stable_mosaic.version = 11 : i64} {
  func.func @_zparams_kernel(%arg0: i32, %arg1: memref<8x32xf32, #tpu.memory_space<vmem>>, %arg2: memref<32x128xf32, #tpu.memory_space<vmem>>, %arg3: memref<1x128xf32, #tpu.memory_space<vmem>>, %arg4: memref<8x128xf32, #tpu.memory_space<vmem>>) attributes {dimension_semantics = [#tpu.dimension_semantics<parallel>], iteration_bounds = array<i64: 1>, scalar_prefetch = 0 : i64, scratch_operands = 0 : i64, tpu.core_type = #tpu.core_type<tc>, window_params = [{transform_indices = @transform_0, window_bounds = array<i64: 8, 32>}, {pipeline_mode = #tpu.pipeline_mode<synchronous>, transform_indices = @transform_1, window_bounds = array<i64: 32, 128>}, {pipeline_mode = #tpu.pipeline_mode<synchronous>, transform_indices = @transform_2, window_bounds = array<i64: 1, 128>}, {transform_indices = @transform_3, window_bounds = array<i64: 8, 128>}]} {
    %c0 = arith.constant 0 : index
    %c0_0 = arith.constant 0 : index
    %0 = vector.load %arg1[%c0, %c0_0] : memref<8x32xf32, #tpu.memory_space<vmem>>, vector<8x32xf32>
    %c0_1 = arith.constant 0 : index
    %c0_2 = arith.constant 0 : index
    %1 = vector.load %arg2[%c0_1, %c0_2] : memref<32x128xf32, #tpu.memory_space<vmem>>, vector<32x128xf32>
    %cst = arith.constant dense<0.000000e+00> : vector<8x128xf32>
    %2 = tpu.matmul %0, %1, %cst {dimension_numbers = #tpu.dot_dimension_numbers<[1], [0], [0], [1], [0, 0, 1, 1], [], []>} : vector<8x32xf32>, vector<32x128xf32>, vector<8x128xf32> -> vector<8x128xf32>
    %c0_3 = arith.constant 0 : index
    %c0_4 = arith.constant 0 : index
    %3 = vector.load %arg3[%c0_3, %c0_4] : memref<1x128xf32, #tpu.memory_space<vmem>>, vector<1x128xf32>
    %4 = vector.broadcast %3 : vector<1x128xf32> to vector<8x128xf32>
    %5 = arith.addf %2, %4 : vector<8x128xf32>
    %6 = tpu.iota {dimensions = array<i32: 1>} : vector<8x128xi32>
    %c4_i32 = arith.constant 4 : i32
    %7 = vector.broadcast %c4_i32 : i32 to vector<8x128xi32>
    %8 = arith.cmpi sge, %6, %7 : vector<8x128xi32>
    %cst_5 = arith.constant 2.000000e+01 : f32
    %9 = vector.broadcast %cst_5 : f32 to vector<8x128xf32>
    %10 = arith.cmpf ogt, %5, %9 : vector<8x128xf32>
    %cst_6 = arith.constant 2.000000e+01 : f32
    %11 = vector.broadcast %cst_6 : f32 to vector<8x128xf32>
    %12 = arith.minimumf %5, %11 : vector<8x128xf32>
    %13 = math.exp %12 : vector<8x128xf32>
    %14 = math.log1p %13 : vector<8x128xf32>
    %15 = arith.select %10, %5, %14 : vector<8x128xi1>, vector<8x128xf32>
    %16 = arith.select %8, %15, %5 : vector<8x128xi1>, vector<8x128xf32>
    %c0_7 = arith.constant 0 : index
    %c0_8 = arith.constant 0 : index
    %17 = vector.load %arg4[%c0_7, %c0_8] : memref<8x128xf32, #tpu.memory_space<vmem>>, vector<8x128xf32>
    tpu.vector_store %arg4[%c0_7, %c0_8], %16 {strides = array<i32>} : memref<8x128xf32, #tpu.memory_space<vmem>>, vector<8x128xf32>,
    return
  }
  func.func @transform_0(%arg0: i32) -> (i32, i32) {
    %c0_i32 = arith.constant 0 : i32
    %c0_i32_0 = arith.constant 0 : i32
    return %arg0, %c0_i32 : i32, i32
  }
  func.func @transform_1(%arg0: i32) -> (i32, i32) {
    %c0_i32 = arith.constant 0 : i32
    %c0_i32_0 = arith.constant 0 : i32
    %c0_i32_1 = arith.constant 0 : i32
    return %c0_i32, %c0_i32_0 : i32, i32
  }
  func.func @transform_2(%arg0: i32) -> (i32, i32) {
    %c0_i32 = arith.constant 0 : i32
    %c0_i32_0 = arith.constant 0 : i32
    %c0_i32_1 = arith.constant 0 : i32
    return %c0_i32, %c0_i32_0 : i32, i32
  }
  func.func @transform_3(%arg0: i32) -> (i32, i32) {
    %c0_i32 = arith.constant 0 : i32
    %c0_i32_0 = arith.constant 0 : i32
    return %arg0, %c0_i32 : i32, i32
  }
}

</mosaic_0001>

<bundles_post_ra>
// kernel: tpu_custom_call.1
= control target key start
LH: loop header
LB: loop body
LE: loop exit
PB: predicated region body
PF: predicated region fallthrough
CT: control target
= control target key end

     0   :  { %8 = vsyncpa [#allocation3], 0  ;;  %s344_s0 = inlined_call_operand.hbm [shape: f32[8,32], index: 0, kind: input, shape index: {}]   ;;  %s345_s1 = inlined_call_operand.hbm [shape: f32[32,128], index: 1, kind: input, shape index: {}]   ;;  %s346_s2 = inlined_call_operand.vmem [shape: f32[1,128], index: 2, kind: input, shape index: {}]   ;;  %s347_s3 = inlined_call_operand.hbm [shape: f32[8,128], index: 3, kind: output, shape index: {}]  }
   0x1   :  { %9 = vsyncpa [#allocation6], 0 }
   0x2   :  { %10 = vsyncpa [#allocation4], 0  ;;  %s270_s12 = smov [#allocation2]   ;;  %s271_s14 = smov [#allocation5]  }
   0x3   :  { %s17_s13 = sshll.u32 %s270_s12, 4  ;;  %s26_s15 = sshll.u32 %s271_s14, 4  ;;  %s18_s13 = int_to_ptr.vmem [resolvable:$true] %s17_s13  ;;  %s298_s15 = int_to_ptr.vmem [resolvable:$true] %s26_s15 }
   0x4   :  { %s198_s18 = scalar_lea.hbm %s344_s0, 128 }
   0x5   :  { %p199_p0 = scmp.ne.s32.totalorder %s344_s0, %s198_s18  ;;  %p202_p1 = scmp.lt.u32.totalorder %s198_s18, %s344_s0 }
   0x7   :  { %p204_p2 = pnand %p202_p1, %p199_p0 }
   0x9   :  { %207 = shalt.err (!%p204_p2)
}
   0xa   :  { %s208_s23 = scalar_lea.vmem %s18_s13, 128  ;;  %p213_p4 = scmp.lt.s32.totalorder %s18_s13, %s18_s13 }
   0xb   :  { %p209_p3 = scmp.ne.s32.totalorder %s18_s13, %s208_s23  ;;  %p214_p5 = scmp.lt.s32.totalorder %s208_s23, %s208_s23 }
   0xd   :  { %p215_p6 = por %p214_p5, %p213_p4 }
   0xf   :  { %p216_p7 = pnand %p215_p6, %p209_p3 }
  0x11   :  { %219 = shalt.err (!%p216_p7)
}
  0x12   :  { %20 = dma.hbm_to_vmem [thread:$0]  %s344_s0, 128, %s18_s13, [#allocation3]  }
  0x13   :  { %s220_s28 = scalar_lea.hbm %s345_s1, 512 }
  0x14   :  { %p221_p8 = scmp.ne.s32.totalorder %s345_s1, %s220_s28  ;;  %p224_p9 = scmp.lt.u32.totalorder %s220_s28, %s345_s1 }
  0x16   :  { %p226_p10 = pnand %p224_p9, %p221_p8 }
  0x18   :  { %229 = shalt.err (!%p226_p10)
}
  0x19   :  { %s230_s6 = scalar_lea.vmem %s298_s15, 512  ;;  %p235_p12 = scmp.lt.s32.totalorder %s298_s15, %s298_s15 }
  0x1a   :  { %p231_p11 = scmp.ne.s32.totalorder %s298_s15, %s230_s6  ;;  %p236_p13 = scmp.lt.s32.totalorder %s230_s6, %s230_s6 }
  0x1c   :  { %p237_p0 = por %p236_p13, %p235_p12 }
  0x1e   :  { %p238_p1 = pnand %p237_p0, %p231_p11 }
  0x20   :  { %241 = shalt.err (!%p238_p1)
}
  0x21   :  { %s272_s0 = smov 128   ;;  %s273_s7 = smov 8  }
  0x22   :  { %32 = dma.hbm_to_vmem [thread:$0]  %s345_s1, 512, %s298_s15, [#allocation6], %s272_s0, %s272_s0, %s273_s7  }
  0x23   :  { %264 = dma.done.wait [#allocation3], 128  }
  0x24   :  { %265 = vsyncadd [#allocation3], 4294967168 }
  0x25   :  { %266 = dma.done.wait [#allocation6], 512  }
  0x26   :  { %267 = vsyncadd [#allocation6], 4294966784  ;;  %v274_v0 = vmov 0.0|0.0   ;;  %vm275_vm0 = vmmov 0   ;;  %v276_v1 = vmov 0.0   ;;  %v42_v2 = vld [vmem:[#allocation5] sm:$0xff]  ;;  %v127_v18 = vlaneseq }
  0x27   :  { %180 = vmatprep.subr.bf16.mxu0 %v274_v0  ;;  %177 = vmatprep.mubr.msk.f32.mxu0 %vm275_vm0, %v276_v1  ;;  %v43_v3 = vld [vmem:[#allocation5 + $0x8] sm:$0xff]  ;;  %v44_v4 = vld [vmem:[#allocation5 + $0x10] sm:$0xff]  ;;  %v45_v6 = vld [vmem:[#allocation5 + $0x18] sm:$0xff]  ;;  %vm53_vm1 = vcmask 261120   ;;  %s277_s11 = smov [#allocation7]  }
  0x28   :  { %v181_v5 = vpack.c.bf16 %v43_v3, %v42_v2  ;;  %v184_v7 = vpack.c.bf16 %v45_v6, %v44_v4  ;;  %v41_v8 = vld [vmem:[#allocation2] sm:$0xff]  ;;  %v128_v20 = vand.u32 127, %v127_v18  ;;  %s152_s12 = sshll.u32 %s277_s11, 4  ;;  %s153_s12 = int_to_ptr.vmem [resolvable:$true] %s152_s12 }
  0x29   :  { %v162_v9 = vld [vmem:[%s346_s2] ss:$0 sm:$0xff]  ;;  %s242_s2 = scalar_lea.vmem %s153_s12, 128  ;;  %p247_p3 = scmp.lt.s32.totalorder %s153_s12, %s153_s12 }
  0x2a   :  { %182 = vmatpush3.bf16.msra.mxu0 %v181_v5  ;;  %vm129_vm2 = vcmp.ge.s32.totalorder %v128_v20, 4  ;;  %p243_p2 = scmp.ne.s32.totalorder %s153_s12, %s242_s2  ;;  %p248_p4 = scmp.lt.s32.totalorder %s242_s2, %s242_s2 }
  0x2b   :  { %183 = vmatprep.subr.bf16.mxu0 %v274_v0 }
  0x2c   :  { %p249_p5 = por %p248_p4, %p247_p3 }
  0x2e   :  { %185 = vmatpush3.bf16.msra.mxu0 %v184_v7  ;;  %p250_p6 = pnand %p249_p5, %p243_p2 }
  0x31   :  { %178 = vmatmul.mubr.msk.f32.vlgmr.msra.gmra.mrb[0].mxu0 %vm53_vm1, %v41_v8 }
 0x104   :  { %v123_v10 = vpop.f32.mrb[0].mxu0 }
 0x105   :  { %v124_v11 = vadd.f32 %v162_v9, %v123_v10  ;;  %v179_v12 = vpop.f32.mrb[1].mxu0 }
 0x107   :  { %v131_v13 = vmin.f32 %v124_v11, 20.0  ;;  %vm130_vm4 = vcmp.gt.f32.partialorder %v124_v11, 20.0 }
 0x109   :  { %v132_v14 = vmul.f32 1.442695, %v131_v13 }
 0x10b   :  { %194 = vpow2.f32 %v132_v14 }
 0x115   :  { %v195_v15 = vpop.eup %194 }
 0x116   :  { %v134_v16 = vadd.f32 1.0, %v195_v15  ;;  %v137_v17 = vmul.f32 -0.5, %v195_v15  ;;  %v140_v21 = vand.u32 2147483647, %v195_v15 }
 0x118   :  { %196 = vlog2.f32 %v134_v16  ;;  %v138_v19 = vadd.f32 1.0, %v137_v17  ;;  %vm141_vm3 = vcmp.lt.f32.partialorder %v140_v21, 0.0004427343 }
 0x11a   :  { %v139_v24 = vmul.f32 %v195_v15, %v138_v19 }
 0x122   :  { %v197_v22 = vpop.eup %196 }
 0x123   :  { %v136_v23 = vmul.f32 0.6931472, %v197_v22 }
 0x125   :  { %v142_v25 = vsel %vm141_vm3, %v139_v24, %v136_v23 }
 0x126   :  { %v143_v26 = vsel %vm130_vm4, %v124_v11, %v142_v25 }
 0x127   :  { %v144_v27 = vsel %vm129_vm2, %v143_v26, %v124_v11 }
 0x128   :  { %145 = vst [vmem:[#allocation7] sm:$0xff] %v144_v27 }
 0x129   :  { %253 = shalt.err (!%p250_p6)
}
 0x12a   :  { %s254_s15 = scalar_lea.hbm %s347_s3, 128 }
 0x12b   :  { %p255_p7 = scmp.ne.s32.totalorder %s347_s3, %s254_s15  ;;  %p258_p8 = scmp.lt.u32.totalorder %s254_s15, %s347_s3 }
 0x12d   :  { %p260_p9 = pnand %p258_p8, %p255_p7 }
 0x12f   :  { %263 = shalt.err (!%p260_p9)
}
 0x130   :  { %155 = dma.vmem_to_hbm [thread:$0]  %s153_s12, 128, %s347_s3, [#allocation4]  }
 0x131   :  { %268 = dma.done.wait [#allocation4], 128  }
 0x132   :  { %269 = vsyncadd [#allocation4], 4294967168 }
 0x133   :  { %159 = vsyncpa [#allocation3], 1 }
 0x134   :  { %160 = vsyncpa [#allocation6], 1 }
 0x135   :  { %161 = vsyncpa [#allocation4], 1 }

</bundles_post_ra>
